<compile_context>
chip_gen: v7x
topology: tpu7x:2x2x1
jax: 0.10.0
libtpu: 0.0.40
codegen_flags: <defaults>
</compile_context>

<pallas_src>
import functools

import jax
import jax.numpy as jnp
from jax.experimental import pallas as pl
from jax.experimental.pallas import tpu as pltpu

_LANES = 128


# ----------------------------------------------------------------------------
# Kernels
# ----------------------------------------------------------------------------
def _ln_rows_kernel(x_ref, g_ref, b_ref, o_ref, *, eps, features):
    """Plain path: one LayerNorm row per tile row (D lane-dense enough)."""
    x = x_ref[...].astype(jnp.float32)                       # (tile_r, D)
    mean = jnp.mean(x, axis=-1, keepdims=True)               # (tile_r, 1)
    diff = x - mean
    denom = max(features - 1, 1)                             # torch unbiased std
    var = jnp.sum(diff * diff, axis=-1, keepdims=True) * (1.0 / denom)
    inv = pl.reciprocal(jnp.sqrt(var) + eps)                 # exact, per-row column
    o_ref[...] = (diff * inv * g_ref[...] + b_ref[...]).astype(o_ref.dtype)


def _ln_folded_kernel(x_ref, g_ref, b_ref, mn_ref, mnt_ref, o_ref, *, eps, features):
    """Folded path: k = 128 // D rows packed along the 128-lane axis.

    Segment statistics are computed with small matmuls against one-hot
    segment matrices (exact at HIGHEST precision); everything stays at full
    128-lane width so loads/stores are lane-dense.
    """
    hp = jax.lax.Precision.HIGHEST
    x = x_ref[...].astype(jnp.float32)                       # (tile_r, 128)
    mn = mn_ref[...]                                         # (128, k) segment one-hots
    mnt = mnt_ref[...]                                       # (k, 128)

    seg_sum = jnp.dot(x, mn, preferred_element_type=jnp.float32, precision=hp)      # (tr, k)
    mean = seg_sum * (1.0 / features)
    mean_b = jnp.dot(mean, mnt, preferred_element_type=jnp.float32, precision=hp)   # (tr, 128)
    diff = x - mean_b
    seg_ssq = jnp.dot(diff * diff, mn, preferred_element_type=jnp.float32, precision=hp)
    denom = max(features - 1, 1)
    inv = pl.reciprocal(jnp.sqrt(seg_ssq * (1.0 / denom)) + eps)                     # (tr, k)
    inv_b = jnp.dot(inv, mnt, preferred_element_type=jnp.float32, precision=hp)      # (tr, 128)
    o_ref[...] = (diff * inv_b * g_ref[...] + b_ref[...]).astype(o_ref.dtype)


# ----------------------------------------------------------------------------
# Tiling / VMEM policy
# ----------------------------------------------------------------------------
def _cdiv(a, b):
    return -(-a // b)


def _round_up(a, b):
    return _cdiv(a, b) * b


def _small_vmem():
    """True on ~64 MiB-VMEM parts (v7x class); False on 128 MiB (v5e/v6e)."""
    try:
        info = pltpu.get_tpu_info()
        cap = int(getattr(info, "vmem_capacity_bytes", 0) or 0)
        if cap > 0:
            return cap <= 64 * 1024 * 1024
    except Exception:
        pass
    return False


def _choose_tile_rows(R, Dk, itemsize, small_vmem):
    """Row tile for an (R, Dk) slab.

    Sized by the HBM-facing input itemsize (f32 temporaries budgeted
    separately), no hard row cap; clamped so the grid keeps >= 2 (preferably
    >= 4) steps for v7x dual-TensorCore sharding and pipeline overlap.
    """
    sub = {4: 8, 2: 16, 1: 32}.get(itemsize, 8)              # sublane packing granule
    if R <= sub:
        return max(int(R), 1)                                # whole-slab block

    hbm_block_target = (4 if small_vmem else 8) * 1024 * 1024
    f32_temp_budget = (12 if small_vmem else 24) * 1024 * 1024

    row_in_bytes = Dk * itemsize
    row_f32_bytes = Dk * 4
    tr = min(hbm_block_target // max(row_in_bytes, 1),
             f32_temp_budget // max(3 * row_f32_bytes, 1))
    tr = max(sub, tr - tr % sub)

    # Keep at least 2 grid steps (4 when there are enough rows): lets the
    # "parallel" axis shard across both v7x TensorCores; harmless on v5e/v6e.
    parts = 4 if R >= 4 * sub else 2
    tr = min(tr, _round_up(_cdiv(R, parts), sub))

    tr = min(tr, _round_up(R, sub))                          # never larger than slab
    return int(max(tr, sub))


def _vmem_limit_bytes(tr, Dk, itemsize, small_vmem):
    need = (4 * tr * Dk * itemsize       # 2x double-buffered input + output blocks
            + 4 * tr * Dk * 4            # in-kernel f32 temporaries
            + (2 << 20))                 # params / segment matrices / slack
    cap = (48 if small_vmem else 96) * 1024 * 1024
    return int(min(max(need, 32 * 1024 * 1024), cap))


# ----------------------------------------------------------------------------
# Wrapper
# ----------------------------------------------------------------------------
def layer_norm(x, a_2, b_2, eps=1e-6, *, tile_rows=None):
    """x: (..., D); a_2, b_2: (D,).  Returns same shape/dtype as x."""
    orig_shape = x.shape
    D = orig_shape[-1]
    x2d = x.reshape(-1, D)
    R = x2d.shape[0]
    itemsize = x.dtype.itemsize
    small_vmem = _small_vmem()

    gamma = a_2.astype(jnp.float32).reshape(1, D)
    beta = b_2.astype(jnp.float32).reshape(1, D)

    # Lane-density fix: fold k = 128 // D rows into the lane axis when D is a
    # small divisor of 128 and the row count divides.
    k = _LANES // D if (0 < D < _LANES and _LANES % D == 0) else 1
    fold = k > 1 and R > 0 and R % k == 0
    # TODO(synk): D < 128 not dividing 128 (or R % k != 0) falls back to the
    # D-wide path; padding D to 128 outside the kernel would cost an extra
    # full HBM pass, so it is intentionally not done here.

    if fold:
        Dk = _LANES
        Rk = R // k
        xk = x2d.reshape(Rk, Dk)                              # contiguous reshape: free
        gk = jnp.tile(gamma, (1, k))                          # gamma[lane % D]
        bk = jnp.tile(beta, (1, k))
        lane_seg = jnp.arange(_LANES, dtype=jnp.int32) // D
        mn = (lane_seg[:, None] == jnp.arange(k, dtype=jnp.int32)[None, :]
              ).astype(jnp.float32)                           # (128, k)
        mnt = mn.T                                            # (k, 128)

        tr = int(tile_rows) if tile_rows else _choose_tile_rows(Rk, Dk, itemsize, small_vmem)
        kernel = functools.partial(_ln_folded_kernel, eps=eps, features=D)
        out2d = pl.pallas_call(
            kernel,
            out_shape=jax.ShapeDtypeStruct((Rk, Dk), x.dtype),
            grid_spec=pltpu.PrefetchScalarGridSpec(
                num_scalar_prefetch=0,
                grid=(pl.cdiv(Rk, tr),),                      # ragged tail masked by Pallas
                in_specs=[
                    pl.BlockSpec((tr, Dk), lambda i: (i, 0)),
                    pl.BlockSpec((1, Dk), lambda i: (0, 0)),  # gamma (resident)
                    pl.BlockSpec((1, Dk), lambda i: (0, 0)),  # beta  (resident)
                    pl.BlockSpec((Dk, k), lambda i: (0, 0)),  # segment matrix
                    pl.BlockSpec((k, Dk), lambda i: (0, 0)),  # segment matrix^T
                ],
                out_specs=pl.BlockSpec((tr, Dk), lambda i: (i, 0)),
            ),
            compiler_params=pltpu.CompilerParams(
                dimension_semantics=("parallel",),
                vmem_limit_bytes=_vmem_limit_bytes(tr, Dk, itemsize, small_vmem),
            ),
        )(xk, gk, bk, mn, mnt)
        return out2d.reshape(orig_shape)

    # Plain path (D >= 128, D multiple of 128, or shapes that cannot fold).
    tr = int(tile_rows) if tile_rows else _choose_tile_rows(R, D, itemsize, small_vmem)
    kernel = functools.partial(_ln_rows_kernel, eps=eps, features=D)
    out2d = pl.pallas_call(
        kernel,
        out_shape=jax.ShapeDtypeStruct((R, D), x.dtype),
        grid_spec=pltpu.PrefetchScalarGridSpec(
            num_scalar_prefetch=0,
            grid=(pl.cdiv(R, tr),),                           # ragged tail masked by Pallas
            in_specs=[
                pl.BlockSpec((tr, D), lambda i: (i, 0)),
                pl.BlockSpec((1, D), lambda i: (0, 0)),       # gamma (resident)
                pl.BlockSpec((1, D), lambda i: (0, 0)),       # beta  (resident)
            ],
            out_specs=pl.BlockSpec((tr, D), lambda i: (i, 0)),
        ),
        compiler_params=pltpu.CompilerParams(
            dimension_semantics=("parallel",),
            vmem_limit_bytes=_vmem_limit_bytes(tr, D, itemsize, small_vmem),
        ),
    )(x2d, gamma, beta)
    return out2d.reshape(orig_shape)


def _reference(x, a_2, b_2, eps):
    mean = jnp.mean(x, axis=-1, keepdims=True)
    std = jnp.std(x, axis=-1, keepdims=True, ddof=1)          # torch unbiased std
    return a_2 * (x - mean) / (std + eps) + b_2


if __name__ == "__main__":
    key = jax.random.PRNGKey(0)
    B, S, D = 2, 8, 32                                        # batch, seq, hidden
    eps = 1e-6

    x = jax.random.normal(key, (B, S, D), dtype=jnp.float32)
    # Parameter init matching nn.Parameter(torch.ones/zeros(features)).
    a_2 = jnp.ones((D,), dtype=jnp.float32)
    b_2 = jnp.zeros((D,), dtype=jnp.float32)

    out = jax.block_until_ready(layer_norm(x, a_2, b_2, eps))
    ref = _reference(x, a_2, b_2, eps)
    assert out.shape == x.shape and out.dtype == x.dtype
    assert jnp.allclose(out, ref, atol=1e-5, rtol=1e-5), "folded-path mismatch"

    # Row count not divisible by k = 128 // D -> exercises the plain fallback
    # path with a masked ragged last block.
    x2 = jax.random.normal(jax.random.PRNGKey(1), (3, 5, D), dtype=jnp.float32)
    out2 = jax.block_until_ready(layer_norm(x2, a_2, b_2, eps))
    ref2 = _reference(x2, a_2, b_2, eps)
    assert jnp.allclose(out2, ref2, atol=1e-5, rtol=1e-5), "plain-path mismatch"

    # Already lane-dense D = 128 case with non-trivial gamma/beta.
    D3 = 128
    x3 = jax.random.normal(jax.random.PRNGKey(2), (2, 4, D3), dtype=jnp.float32)
    a3 = jnp.full((D3,), 0.5, dtype=jnp.float32)
    b3 = jnp.full((D3,), 0.1, dtype=jnp.float32)
    out3 = jax.block_until_ready(layer_norm(x3, a3, b3, eps))
    ref3 = _reference(x3, a3, b3, eps)
    assert jnp.allclose(out3, ref3, atol=1e-5, rtol=1e-5), "D=128 mismatch"

    print("KERNEL_OK")
</pallas_src>

<mosaic_0001>
module attributes {stable_mosaic.version = 11 : i64} {
  func.func @_ln_folded_kernel(%arg0: i32, %arg1: memref<4x128xf32, #tpu.memory_space<vmem>>, %arg2: memref<1x128xf32, #tpu.memory_space<vmem>>, %arg3: memref<1x128xf32, #tpu.memory_space<vmem>>, %arg4: memref<128x4xf32, #tpu.memory_space<vmem>>, %arg5: memref<4x128xf32, #tpu.memory_space<vmem>>, %arg6: memref<4x128xf32, #tpu.memory_space<vmem>>) attributes {dimension_semantics = [#tpu.dimension_semantics<parallel>], iteration_bounds = array<i64: 1>, scalar_prefetch = 0 : i64, scratch_operands = 0 : i64, tpu.core_type = #tpu.core_type<tc>, window_params = [{transform_indices = @transform_0, window_bounds = array<i64: 4, 128>}, {pipeline_mode = #tpu.pipeline_mode<synchronous>, transform_indices = @transform_1, window_bounds = array<i64: 1, 128>}, {pipeline_mode = #tpu.pipeline_mode<synchronous>, transform_indices = @transform_2, window_bounds = array<i64: 1, 128>}, {pipeline_mode = #tpu.pipeline_mode<synchronous>, transform_indices = @transform_3, window_bounds = array<i64: 128, 4>}, {pipeline_mode = #tpu.pipeline_mode<synchronous>, transform_indices = @transform_4, window_bounds = array<i64: 4, 128>}, {transform_indices = @transform_5, window_bounds = array<i64: 4, 128>}]} {
    %c0 = arith.constant 0 : index
    %c0_0 = arith.constant 0 : index
    %0 = vector.load %arg1[%c0, %c0_0] : memref<4x128xf32, #tpu.memory_space<vmem>>, vector<4x128xf32>
    %c0_1 = arith.constant 0 : index
    %c0_2 = arith.constant 0 : index
    %1 = vector.load %arg4[%c0_1, %c0_2] : memref<128x4xf32, #tpu.memory_space<vmem>>, vector<128x4xf32>
    %c0_3 = arith.constant 0 : index
    %c0_4 = arith.constant 0 : index
    %2 = vector.load %arg5[%c0_3, %c0_4] : memref<4x128xf32, #tpu.memory_space<vmem>>, vector<4x128xf32>
    %cst = arith.constant dense<0.000000e+00> : vector<4x4xf32>
    %3 = tpu.matmul %0, %1, %cst {dimension_numbers = #tpu.dot_dimension_numbers<[1], [0], [0], [1], [0, 0, 1, 1], [], []>, precision = #tpu.contract_precision<fp32>} : vector<4x128xf32>, vector<128x4xf32>, vector<4x4xf32> -> vector<4x4xf32>
    %cst_5 = arith.constant 3.125000e-02 : f32
    %4 = vector.broadcast %cst_5 : f32 to vector<4x4xf32>
    %5 = arith.mulf %3, %4 : vector<4x4xf32>
    %cst_6 = arith.constant dense<0.000000e+00> : vector<4x128xf32>
    %6 = tpu.matmul %5, %2, %cst_6 {dimension_numbers = #tpu.dot_dimension_numbers<[1], [0], [0], [1], [0, 0, 1, 1], [], []>, precision = #tpu.contract_precision<fp32>} : vector<4x4xf32>, vector<4x128xf32>, vector<4x128xf32> -> vector<4x128xf32>
    %7 = arith.subf %0, %6 : vector<4x128xf32>
    %8 = arith.mulf %7, %7 : vector<4x128xf32>
    %cst_7 = arith.constant dense<0.000000e+00> : vector<4x4xf32>
    %9 = tpu.matmul %8, %1, %cst_7 {dimension_numbers = #tpu.dot_dimension_numbers<[1], [0], [0], [1], [0, 0, 1, 1], [], []>, precision = #tpu.contract_precision<fp32>} : vector<4x128xf32>, vector<128x4xf32>, vector<4x4xf32> -> vector<4x4xf32>
    %cst_8 = arith.constant 0.0322580636 : f32
    %10 = vector.broadcast %cst_8 : f32 to vector<4x4xf32>
    %11 = arith.mulf %9, %10 : vector<4x4xf32>
    %12 = math.sqrt %11 : vector<4x4xf32>
    %cst_9 = arith.constant 9.99999997E-7 : f32
    %13 = vector.broadcast %cst_9 : f32 to vector<4x4xf32>
    %14 = arith.addf %12, %13 : vector<4x4xf32>
    %15 = tpu.reciprocal %14 : vector<4x4xf32> -> vector<4x4xf32>
    %cst_10 = arith.constant dense<0.000000e+00> : vector<4x128xf32>
    %16 = tpu.matmul %15, %2, %cst_10 {dimension_numbers = #tpu.dot_dimension_numbers<[1], [0], [0], [1], [0, 0, 1, 1], [], []>, precision = #tpu.contract_precision<fp32>} : vector<4x4xf32>, vector<4x128xf32>, vector<4x128xf32> -> vector<4x128xf32>
    %17 = arith.mulf %7, %16 : vector<4x128xf32>
    %c0_11 = arith.constant 0 : index
    %c0_12 = arith.constant 0 : index
    %18 = vector.load %arg2[%c0_11, %c0_12] : memref<1x128xf32, #tpu.memory_space<vmem>>, vector<1x128xf32>
    %19 = vector.broadcast %18 : vector<1x128xf32> to vector<4x128xf32>
    %20 = arith.mulf %17, %19 : vector<4x128xf32>
    %c0_13 = arith.constant 0 : index
    %c0_14 = arith.constant 0 : index
    %21 = vector.load %arg3[%c0_13, %c0_14] : memref<1x128xf32, #tpu.memory_space<vmem>>, vector<1x128xf32>
    %22 = vector.broadcast %21 : vector<1x128xf32> to vector<4x128xf32>
    %23 = arith.addf %20, %22 : vector<4x128xf32>
    %c0_15 = arith.constant 0 : index
    %c0_16 = arith.constant 0 : index
    %24 = vector.load %arg6[%c0_15, %c0_16] : memref<4x128xf32, #tpu.memory_space<vmem>>, vector<4x128xf32>
    tpu.vector_store %arg6[%c0_15, %c0_16], %23 {strides = array<i32>} : memref<4x128xf32, #tpu.memory_space<vmem>>, vector<4x128xf32>,
    return
  }
  func.func @transform_0(%arg0: i32) -> (i32, i32) {
    %c0_i32 = arith.constant 0 : i32
    %c0_i32_0 = arith.constant 0 : i32
    return %arg0, %c0_i32 : i32, i32
  }
  func.func @transform_1(%arg0: i32) -> (i32, i32) {
    %c0_i32 = arith.constant 0 : i32
    %c0_i32_0 = arith.constant 0 : i32
    %c0_i32_1 = arith.constant 0 : i32
    return %c0_i32, %c0_i32_0 : i32, i32
  }
  func.func @transform_2(%arg0: i32) -> (i32, i32) {
    %c0_i32 = arith.constant 0 : i32
    %c0_i32_0 = arith.constant 0 : i32
    %c0_i32_1 = arith.constant 0 : i32
    return %c0_i32, %c0_i32_0 : i32, i32
  }
  func.func @transform_3(%arg0: i32) -> (i32, i32) {
    %c0_i32 = arith.constant 0 : i32
    %c0_i32_0 = arith.constant 0 : i32
    %c0_i32_1 = arith.constant 0 : i32
    return %c0_i32, %c0_i32_0 : i32, i32
  }
  func.func @transform_4(%arg0: i32) -> (i32, i32) {
    %c0_i32 = arith.constant 0 : i32
    %c0_i32_0 = arith.constant 0 : i32
    %c0_i32_1 = arith.constant 0 : i32
    return %c0_i32, %c0_i32_0 : i32, i32
  }
  func.func @transform_5(%arg0: i32) -> (i32, i32) {
    %c0_i32 = arith.constant 0 : i32
    %c0_i32_0 = arith.constant 0 : i32
    return %arg0, %c0_i32 : i32, i32
  }
}

</mosaic_0001>

<bundles_post_ra>
// kernel: tpu_custom_call.1
= control target key start
LH: loop header
LB: loop body
LE: loop exit
PB: predicated region body
PF: predicated region fallthrough
CT: control target
= control target key end

     0   :  { %v3339_v3 = vmov 0.0|0.0   ;;  %vm3340_vm0 = vmmov 0   ;;  %v3341_v8 = vmov 0.0   ;;  %s3898_s0 = inlined_call_operand.vmem [shape: f32[4,128], index: 0, kind: input, shape index: {}]   ;;  %s3899_s1 = inlined_call_operand.vmem [shape: f32[1,128], index: 1, kind: input, shape index: {}]   ;;  %s3900_s2 = inlined_call_operand.vmem [shape: f32[1,128], index: 2, kind: input, shape index: {}]   ;;  %s3901_s3 = inlined_call_operand.vmem [shape: f32[128,4], index: 3, kind: input, shape index: {}]   ;;  %s3902_s4 = inlined_call_operand.vmem [shape: f32[4,128], index: 4, kind: input, shape index: {}]   ;;  %s3903_s5 = inlined_call_operand.hbm [shape: f32[4,128], index: 5, kind: output, shape index: {}]  }
   0x1   :  { %v22_v0 = vld [vmem:[%s3901_s3] sm:$0xff]  ;;  %v23_v1 = vld [vmem:[%s3901_s3 + $0x8] sm:$0xff]  ;;  %v24_v2 = vld [vmem:[%s3901_s3 + $0x10] sm:$0xff]  ;;  %2979 = vmatprep.subr.bf16.mxu0 %v3339_v3  ;;  %2531 = vmatprep.mubr.msk.f32.mxu0 %vm3340_vm0, %v3341_v8 }
   0x2   :  { %v40_v4 = vand.u32 4294901760, %v22_v0  ;;  %v43_v5 = vand.u32 4294901760, %v23_v1  ;;  %v25_v6 = vld [vmem:[%s3901_s3 + $0x18] sm:$0xff]  ;;  %v46_v7 = vand.u32 4294901760, %v24_v2  ;;  %v26_v10 = vld [vmem:[%s3901_s3 + $0x20] sm:$0xff]  ;;  %v27_v11 = vld [vmem:[%s3901_s3 + $0x28] sm:$0xff]  ;;  %2709 = vmatprep.subr.mxu1 %v3341_v8  ;;  %2711 = vmatprep.mubr.msk.f32.mxu1 %vm3340_vm0, %v3341_v8 }
   0x3   :  { %v49_v9 = vand.u32 4294901760, %v25_v6  ;;  %v52_v14 = vand.u32 4294901760, %v26_v10  ;;  %v55_v15 = vand.u32 4294901760, %v27_v11  ;;  %v28_v16 = vld [vmem:[%s3901_s3 + $0x30] sm:$0xff]  ;;  %v29_v17 = vld [vmem:[%s3901_s3 + $0x38] sm:$0xff] }
   0x4   :  { %v3397_v12 = vpack.c.bf16 %v43_v5, %v40_v4 }
   0x5   :  { %v3400_v13 = vpack.c.bf16 %v49_v9, %v46_v7 }
   0x6   :  { %2981 = vmatpush3.bf16.msra.mxu0 %v3397_v12 }
   0x7   :  { %2982 = vmatprep.subr.bf16.mxu0 %v3339_v3 }
   0x8   :  { %10 = vsyncpa [#allocation3], 0  ;;  %v3410_v18 = vpack.c.bf16 %v55_v15, %v52_v14  ;;  %v58_v19 = vand.u32 4294901760, %v28_v16  ;;  %v61_v20 = vand.u32 4294901760, %v29_v17  ;;  %v30_v21 = vld [vmem:[%s3901_s3 + $0x40] sm:$0xff]  ;;  %v31_v23 = vld [vmem:[%s3901_s3 + $0x48] sm:$0xff]  ;;  %v3448_v34 = vsub.f32 %v22_v0, %v40_v4 }
   0x9   :  { %v3418_v22 = vld [vmem:[%s3898_s0] sm:$0xf]  ;;  %v32_v24 = vld [vmem:[%s3901_s3 + $0x50] sm:$0xff]  ;;  %v33_v25 = vld [vmem:[%s3901_s3 + $0x58] sm:$0xff]  ;;  %v64_v27 = vand.u32 4294901760, %v30_v21  ;;  %v67_v33 = vand.u32 4294901760, %v31_v23  ;;  %v3450_v35 = vsub.f32 %v23_v1, %v43_v5  ;;  %v3457_v43 = vsub.f32 %v24_v2, %v46_v7 }
   0xa   :  { %2984 = vmatpush3.bf16.msra.mxu0 %v3400_v13  ;;  %v34_v26 = vld [vmem:[%s3901_s3 + $0x60] sm:$0xff]  ;;  %v35_v28 = vld [vmem:[%s3901_s3 + $0x68] sm:$0xff]  ;;  %v36_v29 = vld [vmem:[%s3901_s3 + $0x70] sm:$0xff]  ;;  %v3443_v31 = vand.u32 4294901760, %v3418_v22  ;;  %v3446_v32 = vpack.c.bf16 %v61_v20, %v58_v19  ;;  %v70_v36 = vand.u32 4294901760, %v32_v24  ;;  %v73_v37 = vand.u32 4294901760, %v33_v25 }
   0xb   :  { %2985 = vmatprep.subr.bf16.mxu0 %v3339_v3  ;;  %v37_v30 = vld [vmem:[%s3901_s3 + $0x78] sm:$0xff]  ;;  %v76_v38 = vand.u32 4294901760, %v34_v26  ;;  %v79_v39 = vand.u32 4294901760, %v35_v28  ;;  %v82_v40 = vand.u32 4294901760, %v36_v29  ;;  %v3459_v44 = vsub.f32 %v25_v6, %v49_v9  ;;  %s3342_s30 = smov [#allocation2]  }
   0xc   :  { %v85_v41 = vand.u32 4294901760, %v37_v30  ;;  %v3455_v42 = vsub.f32 %v3418_v22, %v3443_v31  ;;  %v3462_v45 = vpack.c.bf16 %v67_v33, %v64_v27  ;;  %v133_v46 = vand.u32 4294901760, %v3448_v34  ;;  %s2261_s6 = sshll.u32 %s3342_s30, 4  ;;  %s2262_s6 = int_to_ptr.vmem [resolvable:$true] %s2261_s6 }
   0xd   :  { %v140_v47 = vand.u32 4294901760, %v3450_v35  ;;  %v3466_v48 = vsub.f32 %v26_v10, %v52_v14  ;;  %v3469_v49 = vpack.c.bf16 %v73_v37, %v70_v36  ;;  %v3471_v50 = vpack.c.bf16 %v79_v39, %v76_v38  ;;  %s3315_s7 = scalar_lea.vmem %s2262_s6, 64  ;;  %p3320_p1 = scmp.lt.s32.totalorder %s2262_s6, %s2262_s6 }
   0xe   :  { %2987 = vmatpush3.bf16.msra.mxu0 %v3410_v18  ;;  %v3473_v51 = vpack.c.bf16 %v85_v41, %v82_v40  ;;  %v122_v52 = vand.u32 4294901760, %v3455_v42  ;;  %v147_v53 = vand.u32 4294901760, %v3457_v43  ;;  %v154_v54 = vand.u32 4294901760, %v3459_v44  ;;  %p3316_p0 = scmp.ne.s32.totalorder %s2262_s6, %s3315_s7  ;;  %p3321_p2 = scmp.lt.s32.totalorder %s3315_s7, %s3315_s7 }
   0xf   :  { %2988 = vmatprep.subr.bf16.mxu0 %v3339_v3  ;;  %v3478_v55 = vsub.f32 %v27_v11, %v55_v15  ;;  %v134_v56 = vsub.f32 %v3448_v34, %v133_v46  ;;  %v141_v57 = vsub.f32 %v3450_v35, %v140_v47  ;;  %v161_v58 = vand.u32 4294901760, %v3466_v48 }
  0x10   :  { %v3484_v59 = vsub.f32 %v28_v16, %v58_v19  ;;  %v3487_v60 = vsub.f32 %v29_v17, %v61_v20  ;;  %v3489_v61 = vsub.f32 %v30_v21, %v64_v27  ;;  %v3491_v62 = vsub.f32 %v31_v23, %v67_v33  ;;  %p3322_p3 = por %p3321_p2, %p3320_p1 }
  0x11   :  { %v3493_v63 = vsub.f32 %v32_v24, %v70_v36  ;;  %v3495_v0 = vsub.f32 %v33_v25, %v73_v37  ;;  %v3497_v1 = vsub.f32 %v34_v26, %v76_v38  ;;  %v3499_v2 = vsub.f32 %v35_v28, %v79_v39 }
  0x12   :  { %2990 = vmatpush3.bf16.msra.mxu0 %v3446_v32  ;;  %v3501_v4 = vsub.f32 %v36_v29, %v82_v40  ;;  %v123_v5 = vsub.f32 %v3455_v42, %v122_v52  ;;  %v148_v6 = vsub.f32 %v3457_v43, %v147_v53  ;;  %v168_v7 = vand.u32 4294901760, %v3478_v55  ;;  %p3323_p4 = pnand %p3322_p3, %p3316_p0 }
  0x13   :  { %2991 = vmatprep.subr.bf16.mxu0 %v3339_v3  ;;  %v3508_v9 = vsub.f32 %v37_v30, %v85_v41  ;;  %v135_v10 = vand.u32 4294901760, %v134_v56  ;;  %v142_v11 = vand.u32 4294901760, %v141_v57  ;;  %v155_v14 = vsub.f32 %v3459_v44, %v154_v54 }
  0x14   :  { %v175_v15 = vand.u32 4294901760, %v3484_v59  ;;  %v182_v16 = vand.u32 4294901760, %v3487_v60  ;;  %v189_v17 = vand.u32 4294901760, %v3489_v61  ;;  %v196_v19 = vand.u32 4294901760, %v3491_v62 }
  0x15   :  { %v203_v20 = vand.u32 4294901760, %v3493_v63  ;;  %v210_v21 = vand.u32 4294901760, %v3495_v0  ;;  %v217_v23 = vand.u32 4294901760, %v3497_v1  ;;  %v224_v24 = vand.u32 4294901760, %v3499_v2 }
  0x16   :  { %2993 = vmatpush3.bf16.msra.mxu0 %v3462_v45  ;;  %v231_v25 = vand.u32 4294901760, %v3501_v4  ;;  %v238_v26 = vand.u32 4294901760, %v3508_v9  ;;  %v3523_v27 = vpack.c.bf16 %v140_v47, %v133_v46  ;;  %v3525_v28 = vpack.c.bf16 %v154_v54, %v147_v53 }
  0x17   :  { %2994 = vmatprep.subr.bf16.mxu0 %v3339_v3  ;;  %v3527_v29 = vpack.c.bf16 %v168_v7, %v161_v58  ;;  %v3530_v30 = vpack.c.bf16 %v182_v16, %v175_v15  ;;  %v3532_v33 = vpack.c.bf16 %v196_v19, %v189_v17  ;;  %v3534_v36 = vpack.c.bf16 %v210_v21, %v203_v20 }
  0x18   :  { %v3536_v37 = vpack.c.bf16 %v224_v24, %v217_v23  ;;  %v3539_v38 = vpack.c.bf16 %v238_v26, %v231_v25  ;;  %v124_v39 = vand.u32 4294901760, %v123_v5  ;;  %v162_v40 = vsub.f32 %v3466_v48, %v161_v58 }
  0x19   :  { %v3543_v41 = vpack.c.bf16 %v142_v11, %v135_v10  ;;  %v149_v46 = vand.u32 4294901760, %v148_v6  ;;  %v156_v47 = vand.u32 4294901760, %v155_v14  ;;  %v169_v53 = vsub.f32 %v3478_v55, %v168_v7 }
  0x1a   :  { %2996 = vmatpush3.bf16.msra.mxu0 %v3469_v49  ;;  %v176_v54 = vsub.f32 %v3484_v59, %v175_v15  ;;  %v163_v57 = vand.u32 4294901760, %v162_v40  ;;  %v183_v58 = vsub.f32 %v3487_v60, %v182_v16  ;;  %v190_v11 = vsub.f32 %v3489_v61, %v189_v17 }
  0x1b   :  { %2997 = vmatprep.subr.bf16.mxu0 %v3339_v3  ;;  %v3549_v56 = vpack.c.bf16 %v156_v47, %v149_v46  ;;  %v170_v5 = vand.u32 4294901760, %v169_v53  ;;  %v197_v14 = vsub.f32 %v3491_v62, %v196_v19  ;;  %v204_v15 = vsub.f32 %v3493_v63, %v203_v20 }
  0x1c   :  { %v177_v6 = vand.u32 4294901760, %v176_v54  ;;  %v184_v10 = vand.u32 4294901760, %v183_v58  ;;  %v211_v46 = vsub.f32 %v3495_v0, %v210_v21  ;;  %v218_v47 = vsub.f32 %v3497_v1, %v217_v23 }
  0x1d   :  { %v3556_v7 = vpack.c.bf16 %v170_v5, %v163_v57  ;;  %v198_v40 = vand.u32 4294901760, %v197_v14  ;;  %v205_v19 = vand.u32 4294901760, %v204_v15  ;;  %v225_v20 = vsub.f32 %v3499_v2, %v224_v24 }
  0x1e   :  { %2999 = vmatpush3.bf16.msra.mxu0 %v3471_v50  ;;  %v3563_v16 = vpack.c.bf16 %v184_v10, %v177_v6  ;;  %v212_v53 = vand.u32 4294901760, %v211_v46  ;;  %v232_v54 = vsub.f32 %v3501_v4, %v231_v25  ;;  %v219_v21 = vand.u32 4294901760, %v218_v47 }
  0x1f   :  { %3000 = vmatprep.subr.bf16.mxu0 %v3339_v3  ;;  %v226_v5 = vand.u32 4294901760, %v225_v20  ;;  %v239_v23 = vsub.f32 %v3508_v9, %v238_v26  ;;  %v3590_v26 = vpack.c.bf16 %v3450_v35, %v3448_v34  ;;  %v3597_v10 = vpack.c.bf16 %v3459_v44, %v3457_v43 }
  0x20   :  { %v3575_v57 = vpack.c.bf16 %v212_v53, %v205_v19  ;;  %v233_v6 = vand.u32 4294901760, %v232_v54  ;;  %v3605_v34 = vpack.c.bf16 %v3478_v55, %v3466_v48  ;;  %v3611_v35 = vpack.c.bf16 %v3487_v60, %v3484_v59 }
  0x21   :  { %v3580_v58 = vpack.c.bf16 %v226_v5, %v219_v21  ;;  %v240_v24 = vand.u32 4294901760, %v239_v23  ;;  %v3617_v43 = vpack.c.bf16 %v3491_v62, %v3489_v61  ;;  %v3623_v44 = vpack.c.bf16 %v3495_v0, %v3493_v63 }
  0x22   :  { %3002 = vmatpush3.bf16.msra.mxu0 %v3473_v51  ;;  %v3629_v48 = vpack.c.bf16 %v3499_v2, %v3497_v1  ;;  %v3635_v55 = vpack.c.bf16 %v3508_v9, %v3501_v4  ;;  %vm685_vm1 = vcmask 1043456   ;;  %vm681_vm2 = vcmask 31744  }
  0x23   :  { %3003 = vmatprep.subr.bf16.mxu0 %v3339_v3  ;;  %v3584_v25 = vpack.c.bf16 %v240_v24, %v233_v6 }
  0x25   :  { %2532 = vmatmul.mubr.f32.vlgmr.msra.gmra.mrb[0].mxu0 %v124_v39  ;;  %v191_v39 = vand.u32 4294901760, %v190_v11 }
  0x26   :  { %3005 = vmatpush3.bf16.msra.mxu0 %v3543_v41  ;;  %2566 = vmatprep.mubr.msk.f32.mxu0 %vm3340_vm0, %v3341_v8 }
  0x27   :  { %3006 = vmatprep.subr.bf16.mxu0 %v3339_v3  ;;  %v3569_v17 = vpack.c.bf16 %v198_v40, %v191_v39 }
  0x2a   :  { %3008 = vmatpush3.bf16.msra.mxu0 %v3549_v56 }
  0x2b   :  { %3009 = vmatprep.subr.bf16.mxu0 %v3339_v3 }
  0x2e   :  { %3011 = vmatpush3.bf16.msra.mxu0 %v3556_v7 }
  0x2f   :  { %3012 = vmatprep.subr.bf16.mxu0 %v3339_v3 }
  0x32   :  { %3014 = vmatpush3.bf16.msra.mxu0 %v3563_v16 }
  0x33   :  { %3015 = vmatprep.subr.bf16.mxu0 %v3339_v3 }
  0x36   :  { %3017 = vmatpush3.bf16.msra.mxu0 %v3569_v17 }
  0x37   :  { %3018 = vmatprep.subr.bf16.mxu0 %v3339_v3 }
  0x3a   :  { %3020 = vmatpush3.bf16.msra.mxu0 %v3575_v57 }
  0x3b   :  { %3021 = vmatprep.subr.bf16.mxu0 %v3339_v3 }
  0x3e   :  { %3023 = vmatpush3.bf16.msra.mxu0 %v3580_v58 }
  0x3f   :  { %3024 = vmatprep.subr.bf16.mxu0 %v3339_v3 }
  0x42   :  { %3026 = vmatpush3.bf16.msra.mxu0 %v3584_v25 }
  0x43   :  { %3027 = vmatprep.subr.bf16.mxu0 %v3339_v3 }
  0x45   :  { %2567 = vmatmul.mubr.f32.vlgmr.msra.gmra.mrb[0].mxu0 %v3443_v31 }
  0x46   :  { %3029 = vmatpush3.bf16.msra.mxu0 %v3590_v26  ;;  %2601 = vmatprep.mubr.msk.f32.mxu0 %vm3340_vm0, %v3341_v8 }
  0x47   :  { %3030 = vmatprep.subr.bf16.mxu0 %v3339_v3 }
  0x4a   :  { %3032 = vmatpush3.bf16.msra.mxu0 %v3597_v10 }
  0x4b   :  { %3033 = vmatprep.subr.bf16.mxu0 %v3339_v3 }
  0x4e   :  { %3035 = vmatpush3.bf16.msra.mxu0 %v3605_v34 }
  0x4f   :  { %3036 = vmatprep.subr.bf16.mxu0 %v3339_v3 }
  0x52   :  { %3038 = vmatpush3.bf16.msra.mxu0 %v3611_v35 }
  0x53   :  { %3039 = vmatprep.subr.bf16.mxu0 %v3339_v3 }
  0x56   :  { %3041 = vmatpush3.bf16.msra.mxu0 %v3617_v43 }
  0x57   :  { %3042 = vmatprep.subr.bf16.mxu0 %v3339_v3 }
  0x5a   :  { %3044 = vmatpush3.bf16.msra.mxu0 %v3623_v44 }
  0x5b   :  { %3045 = vmatprep.subr.bf16.mxu0 %v3339_v3 }
  0x5e   :  { %3047 = vmatpush3.bf16.msra.mxu0 %v3629_v48 }
  0x5f   :  { %3048 = vmatprep.subr.bf16.mxu0 %v3339_v3 }
  0x62   :  { %3050 = vmatpush3.bf16.msra.mxu0 %v3635_v55 }
  0x63   :  { %3051 = vmatprep.subr.bf16.mxu0 %v3339_v3 }
  0x65   :  { %2602 = vmatmul.mubr.f32.vlgmr.msra.gmra.mrb[0].mxu0 %v3455_v42  ;;  %v38_v42 = vld [vmem:[%s3902_s4] sm:$0xf] }
  0x66   :  { %3053 = vmatpush3.bf16.msra.mxu0 %v3397_v12  ;;  %2636 = vmatprep.mubr.msk.f32.mxu0 %vm3340_vm0, %v3341_v8 }
  0x67   :  { %3054 = vmatprep.subr.bf16.mxu0 %v3339_v3 }
  0x6a   :  { %3056 = vmatpush3.bf16.msra.mxu0 %v3400_v13 }
  0x6b   :  { %3057 = vmatprep.subr.bf16.mxu0 %v3339_v3 }
  0x6e   :  { %3059 = vmatpush3.bf16.msra.mxu0 %v3410_v18 }
  0x6f   :  { %3060 = vmatprep.subr.bf16.mxu0 %v3339_v3 }
  0x72   :  { %3062 = vmatpush3.bf16.msra.mxu0 %v3446_v32 }
  0x73   :  { %3063 = vmatprep.subr.bf16.mxu0 %v3339_v3 }
  0x76   :  { %3065 = vmatpush3.bf16.msra.mxu0 %v3462_v45 }
  0x77   :  { %3066 = vmatprep.subr.bf16.mxu0 %v3339_v3 }
  0x7a   :  { %3068 = vmatpush3.bf16.msra.mxu0 %v3469_v49 }
  0x7b   :  { %3069 = vmatprep.subr.bf16.mxu0 %v3339_v3 }
  0x7e   :  { %3071 = vmatpush3.bf16.msra.mxu0 %v3471_v50 }
  0x7f   :  { %3072 = vmatprep.subr.bf16.mxu0 %v3339_v3 }
  0x82   :  { %3074 = vmatpush3.bf16.msra.mxu0 %v3473_v51 }
  0x83   :  { %3075 = vmatprep.subr.bf16.mxu0 %v3339_v3 }
  0x85   :  { %2637 = vmatmul.mubr.f32.vlgmr.msra.gmra.mrb[0].mxu0 %v122_v52  ;;  %v687_v52 = vsel %vm685_vm1, %v38_v42, 0 }
  0x86   :  { %3077 = vmatpush3.bf16.msra.mxu0 %v3523_v27  ;;  %2671 = vmatprep.mubr.msk.f32.mxu0 %vm3340_vm0, %v3341_v8  ;;  %v3704_v59 = vand.u32 4294901760, %v687_v52 }
  0x87   :  { %3078 = vmatprep.subr.bf16.mxu0 %v3339_v3 }
  0x88   :  { %2710 = vmatpush3.msra.mxu1 %v3704_v59 }
  0x89   :  { %2714 = vmatprep.subr.mxu1 %v3341_v8 }
  0x8a   :  { %3080 = vmatpush3.bf16.msra.mxu0 %v3525_v28 }
  0x8b   :  { %3081 = vmatprep.subr.bf16.mxu0 %v3339_v3 }
  0x8e   :  { %3083 = vmatpush3.bf16.msra.mxu0 %v3527_v29 }
  0x8f   :  { %3084 = vmatprep.subr.bf16.mxu0 %v3339_v3 }
  0x92   :  { %3086 = vmatpush3.bf16.msra.mxu0 %v3530_v30 }
  0x93   :  { %3087 = vmatprep.subr.bf16.mxu0 %v3339_v3 }
  0x96   :  { %3089 = vmatpush3.bf16.msra.mxu0 %v3532_v33 }
  0x97   :  { %3090 = vmatprep.subr.bf16.mxu0 %v3339_v3 }
  0x9a   :  { %3092 = vmatpush3.bf16.msra.mxu0 %v3534_v36 }
  0x9b   :  { %3093 = vmatprep.subr.bf16.mxu0 %v3339_v3 }
  0x9e   :  { %3095 = vmatpush3.bf16.msra.mxu0 %v3536_v37 }
  0x9f   :  { %3096 = vmatprep.subr.bf16.mxu0 %v3339_v3 }
  0xa2   :  { %3098 = vmatpush3.bf16.msra.mxu0 %v3539_v38 }
  0xa3   :  { %3099 = vmatprep.subr.bf16.mxu0 %v3339_v3 }
  0xa5   :  { %2672 = vmatmul.mubr.f32.vlgmr.msra.gmra.mrb[0].mxu0 %v3443_v31 }
  0xa6   :  { %3101 = vmatpush3.bf16.msra.mxu0 %v3397_v12  ;;  %2706 = vmatprep.mubr.msk.f32.mxu0 %vm3340_vm0, %v3341_v8 }
  0xa7   :  { %3102 = vmatprep.subr.bf16.mxu0 %v3339_v3 }
  0xaa   :  { %3104 = vmatpush3.bf16.msra.mxu0 %v3400_v13 }
  0xab   :  { %3105 = vmatprep.subr.bf16.mxu0 %v3339_v3 }
  0xae   :  { %3107 = vmatpush3.bf16.msra.mxu0 %v3410_v18 }
  0xaf   :  { %3108 = vmatprep.subr.bf16.mxu0 %v3339_v3 }
  0xb2   :  { %3110 = vmatpush3.bf16.msra.mxu0 %v3446_v32 }
  0xb3   :  { %3111 = vmatprep.subr.bf16.mxu0 %v3339_v3 }
  0xb6   :  { %3113 = vmatpush3.bf16.msra.mxu0 %v3462_v45 }
  0xb7   :  { %3114 = vmatprep.subr.bf16.mxu0 %v3339_v3 }
  0xba   :  { %3116 = vmatpush3.bf16.msra.mxu0 %v3469_v49 }
  0xbb   :  { %3117 = vmatprep.subr.bf16.mxu0 %v3339_v3 }
  0xbe   :  { %3119 = vmatpush3.bf16.msra.mxu0 %v3471_v50 }
  0xbf   :  { %3120 = vmatprep.subr.bf16.mxu0 %v3339_v3 }
  0xc2   :  { %3122 = vmatpush3.bf16.msra.mxu0 %v3473_v51 }
  0xc3   :  { %2949 = vmatprep.subr.mxu0 %v3341_v8 }
  0xc5   :  { %2707 = vmatmul.mubr.f32.vlgmr.msra.gmra.mrb[0].mxu0 %v3443_v31  ;;  %v3711_v31 = vsub.f32 %v687_v52, %v3704_v59 }
  0xc6   :  { %2951 = vmatprep.mubr.msk.f32.mxu0 %vm3340_vm0, %v3341_v8  ;;  %2950 = vmatpush3.msra.mxu0 %v3704_v59 }
  0xc7   :  { %2954 = vmatprep.subr.mxu0 %v3341_v8  ;;  %v3715_v0 = vand.u32 4294901760, %v3711_v31 }
  0xc9   :  { %v769_v4 = vsub.f32 %v3711_v31, %v3715_v0 }
  0xcb   :  { %v3719_v14 = vand.u32 4294901760, %v769_v4 }
 0x198   :  { %v676_v60 = vpop.f32.mrb[0].mxu0 }
 0x199   :  { %v680_v61 = vmul.f32 0.03125, %v676_v60  ;;  %v2708_v62 = vpop.f32.mrb[1].mxu0 }
 0x19b   :  { %v683_v63 = vsel %vm681_vm2, %v680_v61, 0 }
 0x19c   :  { %v755_v1 = vand.u32 4294901760, %v683_v63 }
 0x19e   :  { %v756_v2 = vsub.f32 %v683_v63, %v755_v1 }
 0x1a0   :  { %v757_v9 = vand.u32 4294901760, %v756_v2 }
 0x1a2   :  { %v758_v11 = vsub.f32 %v756_v2, %v757_v9 }
 0x1a4   :  { %v759_v15 = vand.u32 4294901760, %v758_v11 }
 0x1a6   :  { %2712 = vmatmul.mubr.f32.vlgmr.msra.gmra.mrb[0].mxu1 %v759_v15 }
 0x1a7   :  { %2715 = vmatpush3.msra.mxu1 %v3719_v14  ;;  %2716 = vmatprep.mubr.msk.f32.mxu1 %vm3340_vm0, %v3341_v8 }
 0x1a8   :  { %2719 = vmatprep.subr.mxu1 %v3341_v8 }
 0x1ae   :  { %2717 = vmatmul.mubr.f32.vlgmr.msra.gmra.mrb[0].mxu1 %v755_v1 }
 0x1af   :  { %2720 = vmatpush3.msra.mxu1 %v3711_v31  ;;  %2721 = vmatprep.mubr.msk.f32.mxu1 %vm3340_vm0, %v3341_v8 }
 0x1b0   :  { %2724 = vmatprep.subr.mxu1 %v3341_v8 }
 0x1b6   :  { %2722 = vmatmul.mubr.f32.vlgmr.msra.gmra.mrb[0].mxu1 %v756_v2 }
 0x1b7   :  { %2725 = vmatpush3.msra.mxu1 %v3704_v59  ;;  %2726 = vmatprep.mubr.msk.f32.mxu1 %vm3340_vm0, %v3341_v8 }
 0x1b8   :  { %2729 = vmatprep.subr.mxu1 %v3341_v8 }
 0x1be   :  { %2727 = vmatmul.mubr.f32.vlgmr.msra.gmra.mrb[0].mxu1 %v757_v9 }
 0x1bf   :  { %2730 = vmatpush3.msra.mxu1 %v3715_v0  ;;  %2731 = vmatprep.mubr.msk.f32.mxu1 %vm3340_vm0, %v3341_v8 }
 0x1c0   :  { %2734 = vmatprep.subr.mxu1 %v3341_v8 }
 0x1c6   :  { %2732 = vmatmul.mubr.f32.vlgmr.msra.gmra.mrb[0].mxu1 %v755_v1 }
 0x1c7   :  { %2735 = vmatpush3.msra.mxu1 %v3704_v59  ;;  %2736 = vmatprep.mubr.msk.f32.mxu1 %vm3340_vm0, %v3341_v8 }
 0x1c8   :  { %3123 = vmatprep.subr.bf16.mxu1 %v3339_v3 }
 0x1ce   :  { %2737 = vmatmul.mubr.f32.vlgmr.msra.gmra.mrb[0].mxu1 %v755_v1 }
 0x1cf   :  { %3125 = vmatpush3.bf16.msra.mxu1 %v3397_v12  ;;  %2771 = vmatprep.mubr.msk.f32.mxu1 %vm3340_vm0, %v3341_v8 }
 0x1d0   :  { %3126 = vmatprep.subr.bf16.mxu1 %v3339_v3 }
 0x1d3   :  { %3128 = vmatpush3.bf16.msra.mxu1 %v3400_v13 }
 0x1d4   :  { %3129 = vmatprep.subr.bf16.mxu1 %v3339_v3 }
 0x1d7   :  { %3131 = vmatpush3.bf16.msra.mxu1 %v3410_v18 }
 0x1d8   :  { %3132 = vmatprep.subr.bf16.mxu1 %v3339_v3 }
 0x1db   :  { %3134 = vmatpush3.bf16.msra.mxu1 %v3446_v32 }
 0x1dc   :  { %3135 = vmatprep.subr.bf16.mxu1 %v3339_v3 }
 0x1df   :  { %3137 = vmatpush3.bf16.msra.mxu1 %v3462_v45 }
 0x1e0   :  { %3138 = vmatprep.subr.bf16.mxu1 %v3339_v3 }
 0x1e3   :  { %3140 = vmatpush3.bf16.msra.mxu1 %v3469_v49 }
 0x1e4   :  { %3141 = vmatprep.subr.bf16.mxu1 %v3339_v3 }
 0x1e7   :  { %3143 = vmatpush3.bf16.msra.mxu1 %v3471_v50 }
 0x1e8   :  { %3144 = vmatprep.subr.bf16.mxu1 %v3339_v3 }
 0x1eb   :  { %3146 = vmatpush3.bf16.msra.mxu1 %v3473_v51 }
 0x1ec   :  { %3147 = vmatprep.subr.bf16.mxu1 %v3339_v3 }
 0x2a1   :  { %v1131_v39 = vpop.f32.mrb[0].mxu1 }
 0x2a2   :  { %v3760_v40 = vsub.f32 %v3418_v22, %v1131_v39  ;;  %v2738_v46 = vpop.f32.mrb[1].mxu1 }
 0x2a4   :  { %v1136_v47 = vmul.f32 %v3760_v40, %v3760_v40 }
 0x2a6   :  { %v3764_v19 = vand.u32 4294901760, %v1136_v47 }
 0x2a8   :  { %v1219_v53 = vsub.f32 %v1136_v47, %v3764_v19 }
 0x2aa   :  { %v1220_v20 = vand.u32 4294901760, %v1219_v53 }
 0x2ac   :  { %v1221_v54 = vsub.f32 %v1219_v53, %v1220_v20 }
 0x2ae   :  { %v1222_v21 = vand.u32 4294901760, %v1221_v54 }
 0x2b0   :  { %2772 = vmatmul.mubr.f32.vlgmr.msra.gmra.mrb[2].mxu1 %v1222_v21 }
 0x2b1   :  { %3149 = vmatpush3.bf16.msra.mxu1 %v3543_v41  ;;  %2806 = vmatprep.mubr.msk.f32.mxu1 %vm3340_vm0, %v3341_v8 }
 0x2b2   :  { %3150 = vmatprep.subr.bf16.mxu1 %v3339_v3 }
 0x2b5   :  { %3152 = vmatpush3.bf16.msra.mxu1 %v3549_v56 }
 0x2b6   :  { %3153 = vmatprep.subr.bf16.mxu1 %v3339_v3 }
 0x2b9   :  { %3155 = vmatpush3.bf16.msra.mxu1 %v3556_v7  ;;  %v2270_v7 = vld [vmem:[%s3900_s2] ss:$0 sm:$0xff] }
 0x2ba   :  { %3156 = vmatprep.subr.bf16.mxu1 %v3339_v3 }
 0x2bd   :  { %3158 = vmatpush3.bf16.msra.mxu1 %v3563_v16 }
 0x2be   :  { %3159 = vmatprep.subr.bf16.mxu1 %v3339_v3 }
 0x2c1   :  { %3161 = vmatpush3.bf16.msra.mxu1 %v3569_v17 }
 0x2c2   :  { %3162 = vmatprep.subr.bf16.mxu1 %v3339_v3 }
 0x2c5   :  { %3164 = vmatpush3.bf16.msra.mxu1 %v3575_v57 }
 0x2c6   :  { %3165 = vmatprep.subr.bf16.mxu1 %v3339_v3 }
 0x2c9   :  { %3167 = vmatpush3.bf16.msra.mxu1 %v3580_v58 }
 0x2ca   :  { %3168 = vmatprep.subr.bf16.mxu1 %v3339_v3 }
 0x2cd   :  { %3170 = vmatpush3.bf16.msra.mxu1 %v3584_v25 }
 0x2ce   :  { %3171 = vmatprep.subr.bf16.mxu1 %v3339_v3 }
 0x2d0   :  { %2807 = vmatmul.mubr.f32.vlgmr.msra.gmra.mrb[2].mxu1 %v3764_v19 }
 0x2d1   :  { %3173 = vmatpush3.bf16.msra.mxu1 %v3590_v26  ;;  %2841 = vmatprep.mubr.msk.f32.mxu1 %vm3340_vm0, %v3341_v8 }
 0x2d2   :  { %3174 = vmatprep.subr.bf16.mxu1 %v3339_v3 }
 0x2d5   :  { %3176 = vmatpush3.bf16.msra.mxu1 %v3597_v10 }
 0x2d6   :  { %3177 = vmatprep.subr.bf16.mxu1 %v3339_v3 }
 0x2d9   :  { %3179 = vmatpush3.bf16.msra.mxu1 %v3605_v34 }
 0x2da   :  { %3180 = vmatprep.subr.bf16.mxu1 %v3339_v3 }
 0x2dd   :  { %3182 = vmatpush3.bf16.msra.mxu1 %v3611_v35 }
 0x2de   :  { %3183 = vmatprep.subr.bf16.mxu1 %v3339_v3 }
 0x2e1   :  { %3185 = vmatpush3.bf16.msra.mxu1 %v3617_v43 }
 0x2e2   :  { %3186 = vmatprep.subr.bf16.mxu1 %v3339_v3 }
 0x2e5   :  { %3188 = vmatpush3.bf16.msra.mxu1 %v3623_v44 }
 0x2e6   :  { %3189 = vmatprep.subr.bf16.mxu1 %v3339_v3 }
 0x2e9   :  { %3191 = vmatpush3.bf16.msra.mxu1 %v3629_v48 }
 0x2ea   :  { %3192 = vmatprep.subr.bf16.mxu1 %v3339_v3 }
 0x2ed   :  { %3194 = vmatpush3.bf16.msra.mxu1 %v3635_v55 }
 0x2ee   :  { %3195 = vmatprep.subr.bf16.mxu1 %v3339_v3 }
 0x2f0   :  { %2842 = vmatmul.mubr.f32.vlgmr.msra.gmra.mrb[2].mxu1 %v1219_v53 }
 0x2f1   :  { %3197 = vmatpush3.bf16.msra.mxu1 %v3397_v12  ;;  %2876 = vmatprep.mubr.msk.f32.mxu1 %vm3340_vm0, %v3341_v8 }
 0x2f2   :  { %3198 = vmatprep.subr.bf16.mxu1 %v3339_v3 }
 0x2f5   :  { %3200 = vmatpush3.bf16.msra.mxu1 %v3400_v13 }
 0x2f6   :  { %3201 = vmatprep.subr.bf16.mxu1 %v3339_v3 }
 0x2f9   :  { %3203 = vmatpush3.bf16.msra.mxu1 %v3410_v18 }
 0x2fa   :  { %3204 = vmatprep.subr.bf16.mxu1 %v3339_v3 }
 0x2fd   :  { %3206 = vmatpush3.bf16.msra.mxu1 %v3446_v32 }
 0x2fe   :  { %3207 = vmatprep.subr.bf16.mxu1 %v3339_v3 }
 0x301   :  { %3209 = vmatpush3.bf16.msra.mxu1 %v3462_v45 }
 0x302   :  { %3210 = vmatprep.subr.bf16.mxu1 %v3339_v3 }
 0x305   :  { %3212 = vmatpush3.bf16.msra.mxu1 %v3469_v49 }
 0x306   :  { %3213 = vmatprep.subr.bf16.mxu1 %v3339_v3 }
 0x309   :  { %3215 = vmatpush3.bf16.msra.mxu1 %v3471_v50 }
 0x30a   :  { %3216 = vmatprep.subr.bf16.mxu1 %v3339_v3 }
 0x30d   :  { %3218 = vmatpush3.bf16.msra.mxu1 %v3473_v51 }
 0x30e   :  { %3219 = vmatprep.subr.bf16.mxu1 %v3339_v3 }
 0x310   :  { %2877 = vmatmul.mubr.f32.vlgmr.msra.gmra.mrb[2].mxu1 %v1220_v20 }
 0x311   :  { %3221 = vmatpush3.bf16.msra.mxu1 %v3523_v27  ;;  %2911 = vmatprep.mubr.msk.f32.mxu1 %vm3340_vm0, %v3341_v8 }
 0x312   :  { %3222 = vmatprep.subr.bf16.mxu1 %v3339_v3 }
 0x315   :  { %3224 = vmatpush3.bf16.msra.mxu1 %v3525_v28 }
 0x316   :  { %3225 = vmatprep.subr.bf16.mxu1 %v3339_v3 }
 0x319   :  { %3227 = vmatpush3.bf16.msra.mxu1 %v3527_v29 }
 0x31a   :  { %3228 = vmatprep.subr.bf16.mxu1 %v3339_v3 }
 0x31d   :  { %3230 = vmatpush3.bf16.msra.mxu1 %v3530_v30 }
 0x31e   :  { %3231 = vmatprep.subr.bf16.mxu1 %v3339_v3 }
 0x321   :  { %3233 = vmatpush3.bf16.msra.mxu1 %v3532_v33 }
 0x322   :  { %3234 = vmatprep.subr.bf16.mxu1 %v3339_v3 }
 0x325   :  { %3236 = vmatpush3.bf16.msra.mxu1 %v3534_v36 }
 0x326   :  { %3237 = vmatprep.subr.bf16.mxu1 %v3339_v3 }
 0x329   :  { %3239 = vmatpush3.bf16.msra.mxu1 %v3536_v37 }
 0x32a   :  { %3240 = vmatprep.subr.bf16.mxu1 %v3339_v3 }
 0x32d   :  { %3242 = vmatpush3.bf16.msra.mxu1 %v3539_v38  ;;  %v2269_v38 = vld [vmem:[%s3899_s1] ss:$0 sm:$0xff] }
 0x32e   :  { %3243 = vmatprep.subr.bf16.mxu1 %v3339_v3 }
 0x330   :  { %2912 = vmatmul.mubr.f32.vlgmr.msra.gmra.mrb[2].mxu1 %v3764_v19 }
 0x331   :  { %3245 = vmatpush3.bf16.msra.mxu1 %v3397_v12  ;;  %2946 = vmatprep.mubr.msk.f32.mxu1 %vm3340_vm0, %v3341_v8 }
 0x332   :  { %3246 = vmatprep.subr.bf16.mxu1 %v3339_v3 }
 0x335   :  { %3248 = vmatpush3.bf16.msra.mxu1 %v3400_v13 }
 0x336   :  { %3249 = vmatprep.subr.bf16.mxu1 %v3339_v3 }
 0x339   :  { %3251 = vmatpush3.bf16.msra.mxu1 %v3410_v18 }
 0x33a   :  { %3252 = vmatprep.subr.bf16.mxu1 %v3339_v3 }
 0x33d   :  { %3254 = vmatpush3.bf16.msra.mxu1 %v3446_v32 }
 0x33e   :  { %3255 = vmatprep.subr.bf16.mxu1 %v3339_v3 }
 0x341   :  { %3257 = vmatpush3.bf16.msra.mxu1 %v3462_v45 }
 0x342   :  { %3258 = vmatprep.subr.bf16.mxu1 %v3339_v3 }
 0x345   :  { %3260 = vmatpush3.bf16.msra.mxu1 %v3469_v49 }
 0x346   :  { %3261 = vmatprep.subr.bf16.mxu1 %v3339_v3 }
 0x349   :  { %3263 = vmatpush3.bf16.msra.mxu1 %v3471_v50 }
 0x34a   :  { %3264 = vmatprep.subr.bf16.mxu1 %v3339_v3 }
 0x34d   :  { %3266 = vmatpush3.bf16.msra.mxu1 %v3473_v51 }
 0x350   :  { %2947 = vmatmul.mubr.f32.vlgmr.msra.gmra.mrb[2].mxu1 %v3764_v19 }
 0x423   :  { %v1774_v12 = vpop.f32.mrb[2].mxu1 }
 0x424   :  { %v1778_v13 = vmul.f32 0.032258064, %v1774_v12  ;;  %v2948_v18 = vpop.f32.mrb[3].mxu1 }
 0x426   :  { %3311 = vrsqrt.f32 %v1778_v13  ;;  %vm1781_vm3 = vcmp.eq.f32.partialorder %v1778_v13, inf  ;;  %v1784_v45 = vand.u32 2147483648, %v1778_v13  ;;  %vm1783_vm4 = vcmp.eq.f32.partialorder %v1778_v13, 0.0 }
 0x430   :  { %v3312_v22 = vpop.eup %3311 }
 0x431   :  { %v1780_v32 = vmul.f32 %v3312_v22, %v1778_v13 }
 0x433   :  { %v1782_v27 = vsel %vm1781_vm3, %v1778_v13, %v1780_v32 }
 0x434   :  { %v1785_v49 = vsel %vm1783_vm4, %v1784_v45, %v1782_v27 }
 0x435   :  { %v1786_v28 = vadd.f32 1e-06, %v1785_v49 }
 0x437   :  { %3313 = vrcp.f32 %v1786_v28 }
 0x441   :  { %v3314_v50 = vpop.eup %3313 }
 0x442   :  { %v1789_v3 = vsel %vm681_vm2, %v3314_v50, 0 }
 0x443   :  { %v1857_v29 = vand.u32 4294901760, %v1789_v3 }
 0x445   :  { %v1858_v51 = vsub.f32 %v1789_v3, %v1857_v29 }
 0x447   :  { %v1859_v30 = vand.u32 4294901760, %v1858_v51 }
 0x449   :  { %v1860_v33 = vsub.f32 %v1858_v51, %v1859_v30 }
 0x44b   :  { %v1861_v36 = vand.u32 4294901760, %v1860_v33 }
 0x44d   :  { %2952 = vmatmul.mubr.f32.vlgmr.msra.gmra.mrb[2].mxu0 %v1861_v36 }
 0x44e   :  { %2955 = vmatpush3.msra.mxu0 %v3719_v14  ;;  %2956 = vmatprep.mubr.msk.f32.mxu0 %vm3340_vm0, %v3341_v8 }
 0x44f   :  { %2959 = vmatprep.subr.mxu0 %v3341_v8 }
 0x455   :  { %2957 = vmatmul.mubr.f32.vlgmr.msra.gmra.mrb[2].mxu0 %v1857_v29 }
 0x456   :  { %2960 = vmatpush3.msra.mxu0 %v3711_v31  ;;  %2961 = vmatprep.mubr.msk.f32.mxu0 %vm3340_vm0, %v3341_v8 }
 0x457   :  { %2964 = vmatprep.subr.mxu0 %v3341_v8 }
 0x45d   :  { %2962 = vmatmul.mubr.f32.vlgmr.msra.gmra.mrb[2].mxu0 %v1858_v51 }
 0x45e   :  { %2965 = vmatpush3.msra.mxu0 %v3704_v59  ;;  %2966 = vmatprep.mubr.msk.f32.mxu0 %vm3340_vm0, %v3341_v8 }
 0x45f   :  { %2969 = vmatprep.subr.mxu0 %v3341_v8 }
 0x465   :  { %2967 = vmatmul.mubr.f32.vlgmr.msra.gmra.mrb[2].mxu0 %v1859_v30 }
 0x466   :  { %2970 = vmatpush3.msra.mxu0 %v3715_v0  ;;  %2971 = vmatprep.mubr.msk.f32.mxu0 %vm3340_vm0, %v3341_v8 }
 0x467   :  { %2974 = vmatprep.subr.mxu0 %v3341_v8 }
 0x46d   :  { %2972 = vmatmul.mubr.f32.vlgmr.msra.gmra.mrb[2].mxu0 %v1857_v29 }
 0x46e   :  { %2975 = vmatpush3.msra.mxu0 %v3704_v59  ;;  %2976 = vmatprep.mubr.msk.f32.mxu0 %vm3340_vm0, %v3341_v8 }
 0x475   :  { %2977 = vmatmul.mubr.f32.vlgmr.msra.gmra.mrb[2].mxu0 %v1857_v29 }
 0x548   :  { %v2233_v37 = vpop.f32.mrb[2].mxu0 }
 0x549   :  { %v2237_v41 = vmul.f32 %v2233_v37, %v3760_v40  ;;  %v2978_v56 = vpop.f32.mrb[3].mxu0 }
 0x54b   :  { %v2245_v16 = vmul.f32 %v2269_v38, %v2237_v41 }
 0x54d   :  { %v2253_v17 = vadd.f32 %v2270_v7, %v2245_v16 }
 0x54f   :  { %2254 = vst [vmem:[#allocation2] sm:$0xf] %v2253_v17 }
 0x550   :  { %3326 = shalt.err (!%p3323_p4)
}
 0x551   :  { %s3327_s9 = scalar_lea.hbm %s3903_s5, 64 }
 0x552   :  { %p3328_p5 = scmp.ne.s32.totalorder %s3903_s5, %s3327_s9  ;;  %p3331_p6 = scmp.lt.u32.totalorder %s3327_s9, %s3903_s5 }
 0x554   :  { %p3333_p7 = pnand %p3331_p6, %p3328_p5 }
 0x556   :  { %3336 = shalt.err (!%p3333_p7)
}
 0x557   :  { %2264 = dma.vmem_to_hbm [thread:$0]  %s2262_s6, 64, %s3903_s5, [#allocation3]  }
 0x558   :  { %3337 = dma.done.wait [#allocation3], 64  }
 0x559   :  { %3338 = vsyncadd [#allocation3], 4294967232 }
 0x55a   :  { %2268 = vsyncpa [#allocation3], 1 }

</bundles_post_ra>
